<compile_context>
chip_gen: v7x
topology: tpu7x:2x2x1
jax: 0.10.0
libtpu: 0.0.40
codegen_flags: <defaults>
</compile_context>

<pallas_src>
import functools

import jax
import jax.numpy as jnp
from jax.experimental import pallas as pl
from jax.experimental.pallas import tpu as pltpu

LANE = 128
SUBLANE = 8


def _round_up(v, m):
    return ((v + m - 1) // m) * m


# ----------------------------------------------------------------------------
# Activations (matching the torch choices in the module)
# ----------------------------------------------------------------------------
def _relu(x):
    return jnp.maximum(x, 0.0)


def _sigmoid(x):
    return jax.nn.sigmoid(x)


def _tanh(x):
    return jnp.tanh(x)


def _gelu(x):
    # torch.nn.GELU() default is the exact (erf-based) GELU.
    return 0.5 * x * (1.0 + jax.lax.erf(x / jnp.sqrt(2.0).astype(x.dtype)))


def _selu(x):
    alpha = 1.6732632423543772848170429916717
    scale = 1.0507009873554804934193349852946
    return scale * jnp.where(x > 0, x, alpha * (jnp.exp(x) - 1.0))


_ACTIVATIONS = {
    "relu": _relu,
    "sigmoid": _sigmoid,
    "tanh": _tanh,
    "gelu": _gelu,
    "selu": _selu,
}


# ----------------------------------------------------------------------------
# Fused MLP kernel (one batch tile per grid step; all weights VMEM-resident)
# ----------------------------------------------------------------------------
def _mlp_kernel(*refs, num_layers, activation):
    """refs = (x_ref, w0, b0, w1, b1, ..., wL, bL, o_ref).

    num_layers - 1 hidden Linear+activation layers followed by one output
    Linear with no activation (matching the PyTorch forward()).
    """
    act = _ACTIVATIONS[activation]
    x_ref = refs[0]
    o_ref = refs[-1]
    prm = refs[1:-1]

    h = x_ref[...]                                    # bf16 [tile_b, f0] (native width)
    z = None
    for i in range(num_layers):
        w = prm[2 * i][...]                           # bf16 [in_dim_i, out_dim_i]
        b = prm[2 * i + 1][...]                       # f32  [1, out_dim_i]
        # bf16 into the MXU, f32 accumulation; bias + activation stay in f32
        # (safe on v5e's f32-only VPU/EUP), then one cast back to bf16.
        z = jnp.dot(h, w, preferred_element_type=jnp.float32) + b
        if i < num_layers - 1:
            h = act(z).astype(jnp.bfloat16)           # carry bf16 between layers
    o_ref[...] = z.astype(o_ref.dtype)                # narrow (n_out-wide) store


def _choose_tile_b(batch, tile_b_max):
    """Pick a batch tile: bounded padding waste, >=2 grid steps when free."""
    b8 = _round_up(batch, SUBLANE)
    tile = min(tile_b_max, b8)
    # Prefer >= 2 grid steps when it adds no padding (feeds both v7x TCs;
    # harmless on single-TC v5e/v6e).
    if tile == b8 and b8 > SUBLANE and b8 % (2 * SUBLANE) == 0:
        tile = b8 // 2
    # Re-balance the tile so the grid covers the batch with minimal zero rows.
    n_tiles = -(-b8 // tile)
    tile = _round_up(-(-b8 // n_tiles), SUBLANE)
    return tile, n_tiles * tile


def mlp_forward(x, params, *, activation, tile_b=512, weight_dtype=jnp.bfloat16):
    """x: [batch, feature_lists[0]] f32.  params: list of (W[in, out], b[1, out])."""
    batch, f0 = x.shape
    num_layers = len(params)
    n_out = params[-1][0].shape[1]

    # Per-layer widths: hidden widths are lane-padded (dense MXU N / next K);
    # the first input and the final logits keep their native width.
    dims = [f0] + [w.shape[1] for w, _ in params]
    in_dims = [f0] + [_round_up(d, LANE) for d in dims[1:-1]]
    out_dims = [_round_up(d, LANE) for d in dims[1:-1]] + [n_out]

    tile_b, batch_pad = _choose_tile_b(batch, tile_b)
    grid = (batch_pad // tile_b,)

    # Stream x in bf16; pad the batch dim only (padded rows are sliced off).
    x_b = x.astype(jnp.bfloat16)
    if batch_pad != batch:
        x_b = jnp.pad(x_b, ((0, batch_pad - batch), (0, 0)))

    # Zero-padded weights/biases: padded input rows are zero (so whatever the
    # activation puts in padded lanes contributes nothing), padded output
    # columns and padded bias columns are zero -> numerically exact.
    flat_params = []
    for li, (w, b) in enumerate(params):
        ip, op = in_dims[li], out_dims[li]
        w_pad = (
            jnp.zeros((ip, op), weight_dtype)
            .at[: w.shape[0], : w.shape[1]]
            .set(w.astype(weight_dtype))
        )
        b2 = b.reshape(1, -1).astype(jnp.float32)
        b_pad = jnp.zeros((1, op), jnp.float32).at[:, : b2.shape[1]].set(b2)
        flat_params += [w_pad, b_pad]

    param_bytes = sum(int(a.size) * a.dtype.itemsize for a in flat_params)
    # TODO(synk): if param_bytes alone exceeds the per-core VMEM cap (very
    # large MLPs), switch to layer-streaming (pltpu.emit_pipeline over layers
    # with memory_space=pl.ANY weights) instead of keeping everything resident.

    try:
        hw_vmem = int(pltpu.get_tpu_info().vmem_capacity_bytes)
    except Exception:
        hw_vmem = 64 << 20            # smallest per-core VMEM (v7x)
    vmem_cap = hw_vmem - (8 << 20)    # leave Mosaic scratch headroom

    flops = 2 * batch_pad * sum(i * o for i, o in zip(in_dims, out_dims))
    transcendentals = 0 if activation == "relu" else batch_pad * sum(out_dims[:-1])
    bytes_accessed = batch_pad * f0 * 2 + param_bytes + batch_pad * n_out * 4

    kernel = functools.partial(
        _mlp_kernel, num_layers=num_layers, activation=activation
    )
    out_shape = jax.ShapeDtypeStruct((batch_pad, n_out), jnp.float32)
    x_spec = pl.BlockSpec((tile_b, f0), lambda i: (i, 0))
    out_spec = pl.BlockSpec((tile_b, n_out), lambda i: (i, 0))

    def build(single_buffer_params):
        def const_spec(shape):
            # Constant index_map -> block stays VMEM-resident across the grid.
            if single_buffer_params:
                return pl.BlockSpec(shape, lambda i: (0, 0),
                                    pipeline_mode=pl.Buffered(1))
            return pl.BlockSpec(shape, lambda i: (0, 0))

        in_specs = [x_spec]
        for li in range(num_layers):
            in_specs.append(const_spec((in_dims[li], out_dims[li])))
            in_specs.append(const_spec((1, out_dims[li])))

        pfac = 1 if single_buffer_params else 2
        io_bytes = 2 * tile_b * (f0 * 2 + n_out * 4)        # double-buffered x/out
        act_bytes = 2 * tile_b * max(out_dims + [f0]) * 4   # live activations (f32)
        vmem_limit = int(
            min(max(pfac * param_bytes + io_bytes + act_bytes + (4 << 20), 16 << 20),
                vmem_cap)
        )
        return pl.pallas_call(
            kernel,
            out_shape=out_shape,
            grid=grid,
            in_specs=in_specs,
            out_specs=out_spec,
            compiler_params=pltpu.CompilerParams(
                dimension_semantics=("parallel",),
                vmem_limit_bytes=vmem_limit,
            ),
            cost_estimate=pl.CostEstimate(
                flops=int(flops),
                transcendentals=int(transcendentals),
                bytes_accessed=int(bytes_accessed),
            ),
        )

    try:
        out = build(True)(x_b, *flat_params)
    except Exception:
        # Installed JAX rejected single-buffered constant blocks; fall back to
        # the default double-buffered pipeline (correctness unchanged).
        out = build(False)(x_b, *flat_params)

    return out[:batch]   # strip batch padding; width is already n_out


# ----------------------------------------------------------------------------
# Deterministic parameter construction (xavier-normal weights, bias = 0.01,
# mirroring neural_network.init)
# ----------------------------------------------------------------------------
def make_params(key, feature_lists, n_out):
    dims = list(feature_lists) + [n_out]
    params = []
    for fan_in, fan_out in zip(dims[:-1], dims[1:]):
        key, sub = jax.random.split(key)
        std = (2.0 / (fan_in + fan_out)) ** 0.5
        w = std * jax.random.normal(sub, (fan_in, fan_out), dtype=jnp.float32)
        b = jnp.full((1, fan_out), 0.01, dtype=jnp.float32)
        params.append((w, b))
    return params


# ----------------------------------------------------------------------------
# Pure-JAX references
# ----------------------------------------------------------------------------
def mlp_reference_f32(x, params, *, activation):
    act = _ACTIVATIONS[activation]
    h = x.astype(jnp.float32)
    for i, (w, b) in enumerate(params):
        h = h @ w + b
        if i < len(params) - 1:
            h = act(h)
    return h


def mlp_reference_bf16(x, params, *, activation):
    # Matches the kernel's numerics: bf16 matmul inputs (x and inter-layer
    # activations carried in bf16), f32 accumulation, f32 bias + activation.
    act = _ACTIVATIONS[activation]
    h = x.astype(jnp.bfloat16)
    z = None
    for i, (w, b) in enumerate(params):
        z = jnp.dot(
            h, w.astype(jnp.bfloat16), preferred_element_type=jnp.float32
        ) + b.reshape(1, -1).astype(jnp.float32)
        if i < len(params) - 1:
            h = act(z).astype(jnp.bfloat16)
    return z


if __name__ == "__main__":
    # Small config consistent with the module: an MLP head.
    feature_lists = [32, 64, 64]   # hidden Linear+activation layers
    n_out = 4                      # multi-class -> forward() returns raw logits
    activation = "gelu"
    batch = 8

    key = jax.random.PRNGKey(0)
    key, xkey = jax.random.split(key)
    x = jax.random.normal(xkey, (batch, feature_lists[0]), dtype=jnp.float32)

    params = make_params(key, feature_lists, n_out)

    out = mlp_forward(x, params, activation=activation)
    out = jax.block_until_ready(out)
    assert out.shape == (batch, n_out), out.shape

    # Numerics-matched reference (bf16 matmul inputs, f32 accumulate).
    ref_bf16 = mlp_reference_bf16(x, params, activation=activation)
    assert jnp.allclose(out, ref_bf16, atol=2e-3, rtol=2e-3), (
        "Pallas output diverges from bf16-matched JAX reference"
    )

    # Loose check against the full-f32 PyTorch-semantics reference.
    ref_f32 = mlp_reference_f32(x, params, activation=activation)
    assert jnp.allclose(out, ref_f32, atol=5e-2, rtol=5e-2), (
        "Pallas output diverges from f32 reference beyond bf16 tolerance"
    )

    print("KERNEL_OK")
</pallas_src>

<mosaic_0001>
module attributes {stable_mosaic.version = 11 : i64} {
  func.func @_mlp_kernel(%arg0: i32, %arg1: memref<8x32xbf16, #tpu.memory_space<vmem>>, %arg2: memref<32x128xbf16, #tpu.memory_space<vmem>>, %arg3: memref<1x128xf32, #tpu.memory_space<vmem>>, %arg4: memref<128x128xbf16, #tpu.memory_space<vmem>>, %arg5: memref<1x128xf32, #tpu.memory_space<vmem>>, %arg6: memref<128x4xbf16, #tpu.memory_space<vmem>>, %arg7: memref<1x4xf32, #tpu.memory_space<vmem>>, %arg8: memref<8x4xf32, #tpu.memory_space<vmem>>) attributes {dimension_semantics = [#tpu.dimension_semantics<parallel>], iteration_bounds = array<i64: 1>, scalar_prefetch = 0 : i64, scratch_operands = 0 : i64, tpu.core_type = #tpu.core_type<tc>, window_params = [{transform_indices = @transform_0, window_bounds = array<i64: 8, 32>}, {pipeline_mode = #tpu.pipeline_mode<synchronous>, transform_indices = @transform_1, window_bounds = array<i64: 32, 128>}, {pipeline_mode = #tpu.pipeline_mode<synchronous>, transform_indices = @transform_2, window_bounds = array<i64: 1, 128>}, {pipeline_mode = #tpu.pipeline_mode<synchronous>, transform_indices = @transform_3, window_bounds = array<i64: 128, 128>}, {pipeline_mode = #tpu.pipeline_mode<synchronous>, transform_indices = @transform_4, window_bounds = array<i64: 1, 128>}, {pipeline_mode = #tpu.pipeline_mode<synchronous>, transform_indices = @transform_5, window_bounds = array<i64: 128, 4>}, {pipeline_mode = #tpu.pipeline_mode<synchronous>, transform_indices = @transform_6, window_bounds = array<i64: 1, 4>}, {transform_indices = @transform_7, window_bounds = array<i64: 8, 4>}]} {
    %c0 = arith.constant 0 : index
    %c0_0 = arith.constant 0 : index
    %0 = vector.load %arg1[%c0, %c0_0] : memref<8x32xbf16, #tpu.memory_space<vmem>>, vector<8x32xbf16>
    %c0_1 = arith.constant 0 : index
    %c0_2 = arith.constant 0 : index
    %1 = vector.load %arg2[%c0_1, %c0_2] : memref<32x128xbf16, #tpu.memory_space<vmem>>, vector<32x128xbf16>
    %c0_3 = arith.constant 0 : index
    %c0_4 = arith.constant 0 : index
    %2 = vector.load %arg3[%c0_3, %c0_4] : memref<1x128xf32, #tpu.memory_space<vmem>>, vector<1x128xf32>
    %cst = arith.constant dense<0.000000e+00> : vector<8x128xf32>
    %3 = tpu.matmul %0, %1, %cst {dimension_numbers = #tpu.dot_dimension_numbers<[1], [0], [0], [1], [0, 0, 1, 1], [], []>} : vector<8x32xbf16>, vector<32x128xbf16>, vector<8x128xf32> -> vector<8x128xf32>
    %4 = vector.broadcast %2 : vector<1x128xf32> to vector<8x128xf32>
    %5 = arith.addf %3, %4 : vector<8x128xf32>
    %cst_5 = arith.constant 5.000000e-01 : f32
    %6 = vector.broadcast %cst_5 : f32 to vector<8x128xf32>
    %7 = arith.mulf %6, %5 : vector<8x128xf32>
    %cst_6 = arith.constant 2.000000e+00 : f32
    %8 = math.sqrt %cst_6 : f32
    %9 = vector.broadcast %8 : f32 to vector<8x128xf32>
    %10 = arith.divf %5, %9 : vector<8x128xf32>
    %11 = math.erf %10 : vector<8x128xf32>
    %cst_7 = arith.constant 1.000000e+00 : f32
    %12 = vector.broadcast %cst_7 : f32 to vector<8x128xf32>
    %13 = arith.addf %12, %11 : vector<8x128xf32>
    %14 = arith.mulf %7, %13 : vector<8x128xf32>
    %15 = arith.truncf %14 : vector<8x128xf32> to vector<8x128xbf16>
    %c0_8 = arith.constant 0 : index
    %c0_9 = arith.constant 0 : index
    %16 = vector.load %arg4[%c0_8, %c0_9] : memref<128x128xbf16, #tpu.memory_space<vmem>>, vector<128x128xbf16>
    %c0_10 = arith.constant 0 : index
    %c0_11 = arith.constant 0 : index
    %17 = vector.load %arg5[%c0_10, %c0_11] : memref<1x128xf32, #tpu.memory_space<vmem>>, vector<1x128xf32>
    %cst_12 = arith.constant dense<0.000000e+00> : vector<8x128xf32>
    %18 = tpu.matmul %15, %16, %cst_12 {dimension_numbers = #tpu.dot_dimension_numbers<[1], [0], [0], [1], [0, 0, 1, 1], [], []>} : vector<8x128xbf16>, vector<128x128xbf16>, vector<8x128xf32> -> vector<8x128xf32>
    %19 = vector.broadcast %17 : vector<1x128xf32> to vector<8x128xf32>
    %20 = arith.addf %18, %19 : vector<8x128xf32>
    %cst_13 = arith.constant 5.000000e-01 : f32
    %21 = vector.broadcast %cst_13 : f32 to vector<8x128xf32>
    %22 = arith.mulf %21, %20 : vector<8x128xf32>
    %cst_14 = arith.constant 2.000000e+00 : f32
    %23 = math.sqrt %cst_14 : f32
    %24 = vector.broadcast %23 : f32 to vector<8x128xf32>
    %25 = arith.divf %20, %24 : vector<8x128xf32>
    %26 = math.erf %25 : vector<8x128xf32>
    %cst_15 = arith.constant 1.000000e+00 : f32
    %27 = vector.broadcast %cst_15 : f32 to vector<8x128xf32>
    %28 = arith.addf %27, %26 : vector<8x128xf32>
    %29 = arith.mulf %22, %28 : vector<8x128xf32>
    %30 = arith.truncf %29 : vector<8x128xf32> to vector<8x128xbf16>
    %c0_16 = arith.constant 0 : index
    %c0_17 = arith.constant 0 : index
    %31 = vector.load %arg6[%c0_16, %c0_17] : memref<128x4xbf16, #tpu.memory_space<vmem>>, vector<128x4xbf16>
    %c0_18 = arith.constant 0 : index
    %c0_19 = arith.constant 0 : index
    %32 = vector.load %arg7[%c0_18, %c0_19] : memref<1x4xf32, #tpu.memory_space<vmem>>, vector<1x4xf32>
    %cst_20 = arith.constant dense<0.000000e+00> : vector<8x4xf32>
    %33 = tpu.matmul %30, %31, %cst_20 {dimension_numbers = #tpu.dot_dimension_numbers<[1], [0], [0], [1], [0, 0, 1, 1], [], []>} : vector<8x128xbf16>, vector<128x4xbf16>, vector<8x4xf32> -> vector<8x4xf32>
    %34 = vector.broadcast %32 : vector<1x4xf32> to vector<8x4xf32>
    %35 = arith.addf %33, %34 : vector<8x4xf32>
    %c0_21 = arith.constant 0 : index
    %c0_22 = arith.constant 0 : index
    %36 = vector.load %arg8[%c0_21, %c0_22] : memref<8x4xf32, #tpu.memory_space<vmem>>, vector<8x4xf32>
    tpu.vector_store %arg8[%c0_21, %c0_22], %35 {strides = array<i32>} : memref<8x4xf32, #tpu.memory_space<vmem>>, vector<8x4xf32>,
    return
  }
  func.func @transform_0(%arg0: i32) -> (i32, i32) {
    %c0_i32 = arith.constant 0 : i32
    %c0_i32_0 = arith.constant 0 : i32
    return %arg0, %c0_i32 : i32, i32
  }
  func.func @transform_1(%arg0: i32) -> (i32, i32) {
    %c0_i32 = arith.constant 0 : i32
    %c0_i32_0 = arith.constant 0 : i32
    %c0_i32_1 = arith.constant 0 : i32
    return %c0_i32, %c0_i32_0 : i32, i32
  }
  func.func @transform_2(%arg0: i32) -> (i32, i32) {
    %c0_i32 = arith.constant 0 : i32
    %c0_i32_0 = arith.constant 0 : i32
    %c0_i32_1 = arith.constant 0 : i32
    return %c0_i32, %c0_i32_0 : i32, i32
  }
  func.func @transform_3(%arg0: i32) -> (i32, i32) {
    %c0_i32 = arith.constant 0 : i32
    %c0_i32_0 = arith.constant 0 : i32
    %c0_i32_1 = arith.constant 0 : i32
    return %c0_i32, %c0_i32_0 : i32, i32
  }
  func.func @transform_4(%arg0: i32) -> (i32, i32) {
    %c0_i32 = arith.constant 0 : i32
    %c0_i32_0 = arith.constant 0 : i32
    %c0_i32_1 = arith.constant 0 : i32
    return %c0_i32, %c0_i32_0 : i32, i32
  }
  func.func @transform_5(%arg0: i32) -> (i32, i32) {
    %c0_i32 = arith.constant 0 : i32
    %c0_i32_0 = arith.constant 0 : i32
    %c0_i32_1 = arith.constant 0 : i32
    return %c0_i32, %c0_i32_0 : i32, i32
  }
  func.func @transform_6(%arg0: i32) -> (i32, i32) {
    %c0_i32 = arith.constant 0 : i32
    %c0_i32_0 = arith.constant 0 : i32
    %c0_i32_1 = arith.constant 0 : i32
    return %c0_i32, %c0_i32_0 : i32, i32
  }
  func.func @transform_7(%arg0: i32) -> (i32, i32) {
    %c0_i32 = arith.constant 0 : i32
    %c0_i32_0 = arith.constant 0 : i32
    return %arg0, %c0_i32 : i32, i32
  }
}

module attributes {stable_mosaic.version = 11 : i64} {
  func.func @_mlp_kernel(%arg0: i32, %arg1: memref<8x32xbf16, #tpu.memory_space<vmem>>, %arg2: memref<32x128xbf16, #tpu.memory_space<vmem>>, %arg3: memref<1x128xf32, #tpu.memory_space<vmem>>, %arg4: memref<128x128xbf16, #tpu.memory_space<vmem>>, %arg5: memref<1x128xf32, #tpu.memory_space<vmem>>, %arg6: memref<128x4xbf16, #tpu.memory_space<vmem>>, %arg7: memref<1x4xf32, #tpu.memory_space<vmem>>, %arg8: memref<8x4xf32, #tpu.memory_space<vmem>>) attributes {dimension_semantics = [#tpu.dimension_semantics<parallel>], iteration_bounds = array<i64: 1>, scalar_prefetch = 0 : i64, scratch_operands = 0 : i64, tpu.core_type = #tpu.core_type<tc>, window_params = [{transform_indices = @transform_0, window_bounds = array<i64: 8, 32>}, {pipeline_mode = #tpu.pipeline_mode<synchronous>, transform_indices = @transform_1, window_bounds = array<i64: 32, 128>}, {pipeline_mode = #tpu.pipeline_mode<synchronous>, transform_indices = @transform_2, window_bounds = array<i64: 1, 128>}, {pipeline_mode = #tpu.pipeline_mode<synchronous>, transform_indices = @transform_3, window_bounds = array<i64: 128, 128>}, {pipeline_mode = #tpu.pipeline_mode<synchronous>, transform_indices = @transform_4, window_bounds = array<i64: 1, 128>}, {pipeline_mode = #tpu.pipeline_mode<synchronous>, transform_indices = @transform_5, window_bounds = array<i64: 128, 4>}, {pipeline_mode = #tpu.pipeline_mode<synchronous>, transform_indices = @transform_6, window_bounds = array<i64: 1, 4>}, {transform_indices = @transform_7, window_bounds = array<i64: 8, 4>}]} {
    %c0 = arith.constant 0 : index
    %c0_0 = arith.constant 0 : index
    %0 = vector.load %arg1[%c0, %c0_0] : memref<8x32xbf16, #tpu.memory_space<vmem>>, vector<8x32xbf16>
    %c0_1 = arith.constant 0 : index
    %c0_2 = arith.constant 0 : index
    %1 = vector.load %arg2[%c0_1, %c0_2] : memref<32x128xbf16, #tpu.memory_space<vmem>>, vector<32x128xbf16>
    %c0_3 = arith.constant 0 : index
    %c0_4 = arith.constant 0 : index
    %2 = vector.load %arg3[%c0_3, %c0_4] : memref<1x128xf32, #tpu.memory_space<vmem>>, vector<1x128xf32>
    %cst = arith.constant dense<0.000000e+00> : vector<8x128xf32>
    %3 = tpu.matmul %0, %1, %cst {dimension_numbers = #tpu.dot_dimension_numbers<[1], [0], [0], [1], [0, 0, 1, 1], [], []>} : vector<8x32xbf16>, vector<32x128xbf16>, vector<8x128xf32> -> vector<8x128xf32>
    %4 = vector.broadcast %2 : vector<1x128xf32> to vector<8x128xf32>
    %5 = arith.addf %3, %4 : vector<8x128xf32>
    %cst_5 = arith.constant 5.000000e-01 : f32
    %6 = vector.broadcast %cst_5 : f32 to vector<8x128xf32>
    %7 = arith.mulf %6, %5 : vector<8x128xf32>
    %cst_6 = arith.constant 2.000000e+00 : f32
    %8 = math.sqrt %cst_6 : f32
    %9 = vector.broadcast %8 : f32 to vector<8x128xf32>
    %10 = arith.divf %5, %9 : vector<8x128xf32>
    %11 = math.erf %10 : vector<8x128xf32>
    %cst_7 = arith.constant 1.000000e+00 : f32
    %12 = vector.broadcast %cst_7 : f32 to vector<8x128xf32>
    %13 = arith.addf %12, %11 : vector<8x128xf32>
    %14 = arith.mulf %7, %13 : vector<8x128xf32>
    %15 = arith.truncf %14 : vector<8x128xf32> to vector<8x128xbf16>
    %c0_8 = arith.constant 0 : index
    %c0_9 = arith.constant 0 : index
    %16 = vector.load %arg4[%c0_8, %c0_9] : memref<128x128xbf16, #tpu.memory_space<vmem>>, vector<128x128xbf16>
    %c0_10 = arith.constant 0 : index
    %c0_11 = arith.constant 0 : index
    %17 = vector.load %arg5[%c0_10, %c0_11] : memref<1x128xf32, #tpu.memory_space<vmem>>, vector<1x128xf32>
    %cst_12 = arith.constant dense<0.000000e+00> : vector<8x128xf32>
    %18 = tpu.matmul %15, %16, %cst_12 {dimension_numbers = #tpu.dot_dimension_numbers<[1], [0], [0], [1], [0, 0, 1, 1], [], []>} : vector<8x128xbf16>, vector<128x128xbf16>, vector<8x128xf32> -> vector<8x128xf32>
    %19 = vector.broadcast %17 : vector<1x128xf32> to vector<8x128xf32>
    %20 = arith.addf %18, %19 : vector<8x128xf32>
    %cst_13 = arith.constant 5.000000e-01 : f32
    %21 = vector.broadcast %cst_13 : f32 to vector<8x128xf32>
    %22 = arith.mulf %21, %20 : vector<8x128xf32>
    %cst_14 = arith.constant 2.000000e+00 : f32
    %23 = math.sqrt %cst_14 : f32
    %24 = vector.broadcast %23 : f32 to vector<8x128xf32>
    %25 = arith.divf %20, %24 : vector<8x128xf32>
    %26 = math.erf %25 : vector<8x128xf32>
    %cst_15 = arith.constant 1.000000e+00 : f32
    %27 = vector.broadcast %cst_15 : f32 to vector<8x128xf32>
    %28 = arith.addf %27, %26 : vector<8x128xf32>
    %29 = arith.mulf %22, %28 : vector<8x128xf32>
    %30 = arith.truncf %29 : vector<8x128xf32> to vector<8x128xbf16>
    %c0_16 = arith.constant 0 : index
    %c0_17 = arith.constant 0 : index
    %31 = vector.load %arg6[%c0_16, %c0_17] : memref<128x4xbf16, #tpu.memory_space<vmem>>, vector<128x4xbf16>
    %c0_18 = arith.constant 0 : index
    %c0_19 = arith.constant 0 : index
    %32 = vector.load %arg7[%c0_18, %c0_19] : memref<1x4xf32, #tpu.memory_space<vmem>>, vector<1x4xf32>
    %cst_20 = arith.constant dense<0.000000e+00> : vector<8x4xf32>
    %33 = tpu.matmul %30, %31, %cst_20 {dimension_numbers = #tpu.dot_dimension_numbers<[1], [0], [0], [1], [0, 0, 1, 1], [], []>} : vector<8x128xbf16>, vector<128x4xbf16>, vector<8x4xf32> -> vector<8x4xf32>
    %34 = vector.broadcast %32 : vector<1x4xf32> to vector<8x4xf32>
    %35 = arith.addf %33, %34 : vector<8x4xf32>
    %c0_21 = arith.constant 0 : index
    %c0_22 = arith.constant 0 : index
    %36 = vector.load %arg8[%c0_21, %c0_22] : memref<8x4xf32, #tpu.memory_space<vmem>>, vector<8x4xf32>
    tpu.vector_store %arg8[%c0_21, %c0_22], %35 {strides = array<i32>} : memref<8x4xf32, #tpu.memory_space<vmem>>, vector<8x4xf32>,
    return
  }
  func.func @transform_0(%arg0: i32) -> (i32, i32) {
    %c0_i32 = arith.constant 0 : i32
    %c0_i32_0 = arith.constant 0 : i32
    return %arg0, %c0_i32 : i32, i32
  }
  func.func @transform_1(%arg0: i32) -> (i32, i32) {
    %c0_i32 = arith.constant 0 : i32
    %c0_i32_0 = arith.constant 0 : i32
    %c0_i32_1 = arith.constant 0 : i32
    return %c0_i32, %c0_i32_0 : i32, i32
  }
  func.func @transform_2(%arg0: i32) -> (i32, i32) {
    %c0_i32 = arith.constant 0 : i32
    %c0_i32_0 = arith.constant 0 : i32
    %c0_i32_1 = arith.constant 0 : i32
    return %c0_i32, %c0_i32_0 : i32, i32
  }
  func.func @transform_3(%arg0: i32) -> (i32, i32) {
    %c0_i32 = arith.constant 0 : i32
    %c0_i32_0 = arith.constant 0 : i32
    %c0_i32_1 = arith.constant 0 : i32
    return %c0_i32, %c0_i32_0 : i32, i32
  }
  func.func @transform_4(%arg0: i32) -> (i32, i32) {
    %c0_i32 = arith.constant 0 : i32
    %c0_i32_0 = arith.constant 0 : i32
    %c0_i32_1 = arith.constant 0 : i32
    return %c0_i32, %c0_i32_0 : i32, i32
  }
  func.func @transform_5(%arg0: i32) -> (i32, i32) {
    %c0_i32 = arith.constant 0 : i32
    %c0_i32_0 = arith.constant 0 : i32
    %c0_i32_1 = arith.constant 0 : i32
    return %c0_i32, %c0_i32_0 : i32, i32
  }
  func.func @transform_6(%arg0: i32) -> (i32, i32) {
    %c0_i32 = arith.constant 0 : i32
    %c0_i32_0 = arith.constant 0 : i32
    %c0_i32_1 = arith.constant 0 : i32
    return %c0_i32, %c0_i32_0 : i32, i32
  }
  func.func @transform_7(%arg0: i32) -> (i32, i32) {
    %c0_i32 = arith.constant 0 : i32
    %c0_i32_0 = arith.constant 0 : i32
    return %arg0, %c0_i32 : i32, i32
  }
}

</mosaic_0001>

<bundles_post_ra>
// kernel: tpu_custom_call.1
= control target key start
LH: loop header
LB: loop body
LE: loop exit
PB: predicated region body
PF: predicated region fallthrough
CT: control target
= control target key end

     0   :  { %12 = vsyncpa [#allocation3], 0  ;;  %s493_s24 = smov [#allocation2]   ;;  %s637_s0 = inlined_call_operand.vmem [shape: bf16[8,32], index: 0, kind: input, shape index: {}]   ;;  %s638_s1 = inlined_call_operand.hbm [shape: bf16[32,128], index: 1, kind: input, shape index: {}]   ;;  %s639_s2 = inlined_call_operand.vmem [shape: f32[1,128], index: 2, kind: input, shape index: {}]   ;;  %s640_s3 = inlined_call_operand.vmem [shape: bf16[128,128], index: 3, kind: input, shape index: {}]   ;;  %s641_s4 = inlined_call_operand.vmem [shape: f32[1,128], index: 4, kind: input, shape index: {}]   ;;  %s642_s5 = inlined_call_operand.vmem [shape: bf16[128,4], index: 5, kind: input, shape index: {}]   ;;  %s643_s6 = inlined_call_operand.vmem [shape: f32[1,4], index: 6, kind: input, shape index: {}]   ;;  %s644_s7 = inlined_call_operand.vmem [shape: f32[8,4], index: 7, kind: output, shape index: {}]  }
   0x1   :  { %s20_s25 = sshll.u32 %s493_s24, 4  ;;  %s469_s28 = scalar_lea.hbm %s638_s1, 256  ;;  %s21_s25 = int_to_ptr.vmem [resolvable:$true] %s20_s25 }
   0x2   :  { %p470_p0 = scmp.ne.s32.totalorder %s638_s1, %s469_s28  ;;  %p473_p1 = scmp.lt.u32.totalorder %s469_s28, %s638_s1 }
   0x4   :  { %p475_p2 = pnand %p473_p1, %p470_p0 }
   0x6   :  { %478 = shalt.err (!%p475_p2)
}
   0x7   :  { %s479_s10 = scalar_lea.vmem %s21_s25, 256  ;;  %p484_p4 = scmp.lt.s32.totalorder %s21_s25, %s21_s25 }
   0x8   :  { %p480_p3 = scmp.ne.s32.totalorder %s21_s25, %s479_s10  ;;  %p485_p5 = scmp.lt.s32.totalorder %s479_s10, %s479_s10 }
   0xa   :  { %p486_p6 = por %p485_p5, %p484_p4 }
   0xc   :  { %p487_p7 = pnand %p486_p6, %p480_p3 }
   0xe   :  { %490 = shalt.err (!%p487_p7)
}
   0xf   :  { %s494_s11 = smov 64   ;;  %s495_s12 = smov 4  }
  0x10   :  { %26 = dma.hbm_to_vmem [thread:$0]  %s638_s1, 256, %s21_s25, [#allocation3], %s494_s11, %s494_s11, %s495_s12  }
  0x11   :  { %491 = dma.done.wait [#allocation3], 256  }
  0x12   :  { %492 = vsyncadd [#allocation3], 4294967040  ;;  %v496_v0 = vmov 0.0   ;;  %vm497_vm0 = vmmov 0   ;;  %v447_v1 = vld [vmem:[#allocation2] sm:$0xff]   ;;  %v448_v2 = vld [vmem:[#allocation2 + $0x8] sm:$0xff]  }
  0x13   :  { %394 = vmatprep.subr.bf16.mxu0 %v496_v0  ;;  %398 = vmatprep.mubr.msk.bf16.mxu0 %vm497_vm0, %v496_v0  ;;  %v449_v3 = vld [vmem:[%s640_s3] sm:$0xff]   ;;  %vm65_vm1 = vcmask 261120   ;;  %v450_v5 = vld [vmem:[%s640_s3 + $0x8] sm:$0xff]   ;;  %v451_v6 = vld [vmem:[%s640_s3 + $0x10] sm:$0xff]   ;;  %vm344_vm2 = vcmask 31744  }
  0x14   :  { %402 = vmatprep.subr.bf16.mxu1 %v496_v0  ;;  %418 = vmatprep.mubr.msk.bf16.mxu1 %vm497_vm0, %v496_v0  ;;  %v41_v4 = vld [vmem:[%s637_s0] sm:$0xf]  ;;  %v452_v7 = vld [vmem:[%s640_s3 + $0x18] sm:$0xff]   ;;  %v454_v9 = vld [vmem:[%s640_s3 + $0x28] sm:$0xff]  }
  0x15   :  { %395 = vmatpush3.bf16.msra.mxu0 %v447_v1  ;;  %403 = vmatpush3.bf16.msra.mxu1 %v449_v3  ;;  %v453_v8 = vld [vmem:[%s640_s3 + $0x20] sm:$0xff]   ;;  %v455_v10 = vld [vmem:[%s640_s3 + $0x30] sm:$0xff]   ;;  %v456_v11 = vld [vmem:[%s640_s3 + $0x38] sm:$0xff]  }
  0x16   :  { %396 = vmatprep.subr.bf16.mxu0 %v496_v0  ;;  %404 = vmatprep.subr.bf16.mxu1 %v496_v0  ;;  %v457_v12 = vld [vmem:[%s642_s5] sm:$0xff]   ;;  %v458_v13 = vld [vmem:[%s642_s5 + $0x8] sm:$0xff]   ;;  %v459_v14 = vld [vmem:[%s642_s5 + $0x10] sm:$0xff]  }
  0x17   :  { %v351_v15 = vld [vmem:[%s639_s2] ss:$0 sm:$0xff]  ;;  %v460_v27 = vld [vmem:[%s642_s5 + $0x18] sm:$0xff]   ;;  %v462_v29 = vld [vmem:[%s642_s5 + $0x28] sm:$0xff]  }
  0x18   :  { %v461_v28 = vld [vmem:[%s642_s5 + $0x20] sm:$0xff]   ;;  %v463_v30 = vld [vmem:[%s642_s5 + $0x30] sm:$0xff]   ;;  %v464_v31 = vld [vmem:[%s642_s5 + $0x38] sm:$0xff]  }
  0x19   :  { %397 = vmatpush3.bf16.msra.mxu0 %v448_v2  ;;  %405 = vmatpush3.bf16.msra.mxu1 %v450_v5  ;;  %v355_v32 = vld [vmem:[%s641_s4] ss:$0 sm:$0xff] }
  0x1a   :  { %422 = vmatprep.subr.bf16.mxu0 %v496_v0  ;;  %406 = vmatprep.subr.bf16.mxu1 %v496_v0  ;;  %v364_v44 = vld [vmem:[%s643_s6] ss:$0 sm:$0xff] }
  0x1c   :  { %399 = vmatmul.mubr.msk.bf16.vlgmr.msra.gmra.mrb[0].mxu0 %vm65_vm1, %v41_v4 }
  0x1d   :  { %438 = vmatprep.mubr.msk.bf16.mxu0 %vm497_vm0, %v496_v0  ;;  %407 = vmatpush3.bf16.msra.mxu1 %v451_v6 }
  0x1e   :  { %408 = vmatprep.subr.bf16.mxu1 %v496_v0  ;;  %423 = vmatpush3.bf16.msra.mxu0 %v457_v12 }
  0x1f   :  { %424 = vmatprep.subr.bf16.mxu0 %v496_v0 }
  0x21   :  { %409 = vmatpush3.bf16.msra.mxu1 %v452_v7 }
  0x22   :  { %410 = vmatprep.subr.bf16.mxu1 %v496_v0  ;;  %425 = vmatpush3.bf16.msra.mxu0 %v458_v13 }
  0x23   :  { %426 = vmatprep.subr.bf16.mxu0 %v496_v0 }
  0x25   :  { %411 = vmatpush3.bf16.msra.mxu1 %v453_v8 }
  0x26   :  { %412 = vmatprep.subr.bf16.mxu1 %v496_v0  ;;  %427 = vmatpush3.bf16.msra.mxu0 %v459_v14 }
  0x27   :  { %428 = vmatprep.subr.bf16.mxu0 %v496_v0 }
  0x29   :  { %413 = vmatpush3.bf16.msra.mxu1 %v454_v9 }
  0x2a   :  { %414 = vmatprep.subr.bf16.mxu1 %v496_v0  ;;  %429 = vmatpush3.bf16.msra.mxu0 %v460_v27 }
  0x2b   :  { %430 = vmatprep.subr.bf16.mxu0 %v496_v0 }
  0x2d   :  { %415 = vmatpush3.bf16.msra.mxu1 %v455_v10 }
  0x2e   :  { %416 = vmatprep.subr.bf16.mxu1 %v496_v0  ;;  %431 = vmatpush3.bf16.msra.mxu0 %v461_v28 }
  0x2f   :  { %432 = vmatprep.subr.bf16.mxu0 %v496_v0 }
  0x31   :  { %417 = vmatpush3.bf16.msra.mxu1 %v456_v11 }
  0x32   :  { %433 = vmatpush3.bf16.msra.mxu0 %v462_v29 }
  0x33   :  { %434 = vmatprep.subr.bf16.mxu0 %v496_v0 }
  0x36   :  { %435 = vmatpush3.bf16.msra.mxu0 %v463_v30 }
  0x37   :  { %436 = vmatprep.subr.bf16.mxu0 %v496_v0 }
  0x3a   :  { %437 = vmatpush3.bf16.msra.mxu0 %v464_v31 }
  0xef   :  { %v103_v16 = vpop.f32.mrb[0].mxu0 }
  0xf0   :  { %v104_v17 = vadd.f32 %v351_v15, %v103_v16  ;;  %v400_v18 = vpop.f32.mrb[1].mxu0 }
  0xf1   :  { %v106_v19 = vpop.f32.mrb[2].mxu0 }
  0xf2   :  { %v111_v20 = vmul.f32 0.70710677, %v104_v17  ;;  %v401_v21 = vpop.f32.mrb[3].mxu0  ;;  %v109_v23 = vmul.f32 0.5, %v104_v17 }
  0xf4   :  { %465 = verf.f32 %v111_v20 }
  0xfe   :  { %v466_v22 = vpop.eup %465 }
  0xff   :  { %v113_v24 = vadd.f32 1.0, %v466_v22 }
 0x101   :  { %v114_v25 = vmul.f32 %v113_v24, %v109_v23 }
 0x103   :  { %v115_v26 = vpack.c.bf16 %v114_v25, %v114_v25 }
 0x105   :  { %419 = vmatmul.mubr.bf16.vlgmr.msra.gmra.mrb[0].mxu1 %v115_v26 }
 0x1d8   :  { %v221_v33 = vpop.f32.mrb[0].mxu1 }
 0x1d9   :  { %v222_v34 = vadd.f32 %v355_v32, %v221_v33  ;;  %v420_v35 = vpop.f32.mrb[1].mxu1 }
 0x1da   :  { %v224_v36 = vpop.f32.mrb[2].mxu1 }
 0x1db   :  { %v228_v37 = vmul.f32 0.70710677, %v222_v34  ;;  %v421_v38 = vpop.f32.mrb[3].mxu1  ;;  %v227_v40 = vmul.f32 0.5, %v222_v34 }
 0x1dd   :  { %467 = verf.f32 %v228_v37 }
 0x1e7   :  { %v468_v39 = vpop.eup %467 }
 0x1e8   :  { %v230_v41 = vadd.f32 1.0, %v468_v39 }
 0x1ea   :  { %v231_v42 = vmul.f32 %v230_v41, %v227_v40 }
 0x1ec   :  { %v232_v43 = vpack.c.bf16 %v231_v42, %v231_v42 }
 0x1ee   :  { %439 = vmatmul.mubr.bf16.vlgmr.msra.gmra.mrb[4].mxu0 %v232_v43 }
 0x2c1   :  { %v338_v45 = vpop.f32.mrb[4].mxu0 }
 0x2c2   :  { %v339_v46 = vadd.f32 %v364_v44, %v338_v45  ;;  %v440_v47 = vpop.f32.mrb[5].mxu0 }
 0x2c3   :  { %v341_v48 = vpop.f32.mrb[6].mxu0 }
 0x2c4   :  { %345 = vst.msk [vmem:[%s644_s7] sm:$0xff] %vm344_vm2, %v339_v46  ;;  %v441_v49 = vpop.f32.mrb[7].mxu0 }
 0x2c5   :  { %350 = vsyncpa [#allocation3], 1 }

// kernel: tpu_custom_call.1
= control target key start
LH: loop header
LB: loop body
LE: loop exit
PB: predicated region body
PF: predicated region fallthrough
CT: control target
= control target key end

     0   :  { %12 = vsyncpa [#allocation3], 0  ;;  %s493_s24 = smov [#allocation2]   ;;  %s637_s0 = inlined_call_operand.vmem [shape: bf16[8,32], index: 0, kind: input, shape index: {}]   ;;  %s638_s1 = inlined_call_operand.hbm [shape: bf16[32,128], index: 1, kind: input, shape index: {}]   ;;  %s639_s2 = inlined_call_operand.vmem [shape: f32[1,128], index: 2, kind: input, shape index: {}]   ;;  %s640_s3 = inlined_call_operand.vmem [shape: bf16[128,128], index: 3, kind: input, shape index: {}]   ;;  %s641_s4 = inlined_call_operand.vmem [shape: f32[1,128], index: 4, kind: input, shape index: {}]   ;;  %s642_s5 = inlined_call_operand.vmem [shape: bf16[128,4], index: 5, kind: input, shape index: {}]   ;;  %s643_s6 = inlined_call_operand.vmem [shape: f32[1,4], index: 6, kind: input, shape index: {}]   ;;  %s644_s7 = inlined_call_operand.vmem [shape: f32[8,4], index: 7, kind: output, shape index: {}]  }
   0x1   :  { %s20_s25 = sshll.u32 %s493_s24, 4  ;;  %s469_s28 = scalar_lea.hbm %s638_s1, 256  ;;  %s21_s25 = int_to_ptr.vmem [resolvable:$true] %s20_s25 }
   0x2   :  { %p470_p0 = scmp.ne.s32.totalorder %s638_s1, %s469_s28  ;;  %p473_p1 = scmp.lt.u32.totalorder %s469_s28, %s638_s1 }
   0x4   :  { %p475_p2 = pnand %p473_p1, %p470_p0 }
   0x6   :  { %478 = shalt.err (!%p475_p2)
}
   0x7   :  { %s479_s10 = scalar_lea.vmem %s21_s25, 256  ;;  %p484_p4 = scmp.lt.s32.totalorder %s21_s25, %s21_s25 }
   0x8   :  { %p480_p3 = scmp.ne.s32.totalorder %s21_s25, %s479_s10  ;;  %p485_p5 = scmp.lt.s32.totalorder %s479_s10, %s479_s10 }
   0xa   :  { %p486_p6 = por %p485_p5, %p484_p4 }
   0xc   :  { %p487_p7 = pnand %p486_p6, %p480_p3 }
   0xe   :  { %490 = shalt.err (!%p487_p7)
}
   0xf   :  { %s494_s11 = smov 64   ;;  %s495_s12 = smov 4  }
  0x10   :  { %26 = dma.hbm_to_vmem [thread:$0]  %s638_s1, 256, %s21_s25, [#allocation3], %s494_s11, %s494_s11, %s495_s12  }
  0x11   :  { %491 = dma.done.wait [#allocation3], 256  }
  0x12   :  { %492 = vsyncadd [#allocation3], 4294967040  ;;  %v496_v0 = vmov 0.0   ;;  %vm497_vm0 = vmmov 0   ;;  %v447_v1 = vld [vmem:[#allocation2] sm:$0xff]   ;;  %v448_v2 = vld [vmem:[#allocation2 + $0x8] sm:$0xff]  }
  0x13   :  { %394 = vmatprep.subr.bf16.mxu0 %v496_v0  ;;  %398 = vmatprep.mubr.msk.bf16.mxu0 %vm497_vm0, %v496_v0  ;;  %v449_v3 = vld [vmem:[%s640_s3] sm:$0xff]   ;;  %vm65_vm1 = vcmask 261120   ;;  %v450_v5 = vld [vmem:[%s640_s3 + $0x8] sm:$0xff]   ;;  %v451_v6 = vld [vmem:[%s640_s3 + $0x10] sm:$0xff]   ;;  %vm344_vm2 = vcmask 31744  }
  0x14   :  { %402 = vmatprep.subr.bf16.mxu1 %v496_v0  ;;  %418 = vmatprep.mubr.msk.bf16.mxu1 %vm497_vm0, %v496_v0  ;;  %v41_v4 = vld [vmem:[%s637_s0] sm:$0xf]  ;;  %v452_v7 = vld [vmem:[%s640_s3 + $0x18] sm:$0xff]   ;;  %v454_v9 = vld [vmem:[%s640_s3 + $0x28] sm:$0xff]  }
  0x15   :  { %395 = vmatpush3.bf16.msra.mxu0 %v447_v1  ;;  %403 = vmatpush3.bf16.msra.mxu1 %v449_v3  ;;  %v453_v8 = vld [vmem:[%s640_s3 + $0x20] sm:$0xff]   ;;  %v455_v10 = vld [vmem:[%s640_s3 + $0x30] sm:$0xff]   ;;  %v456_v11 = vld [vmem:[%s640_s3 + $0x38] sm:$0xff]  }
  0x16   :  { %396 = vmatprep.subr.bf16.mxu0 %v496_v0  ;;  %404 = vmatprep.subr.bf16.mxu1 %v496_v0  ;;  %v457_v12 = vld [vmem:[%s642_s5] sm:$0xff]   ;;  %v458_v13 = vld [vmem:[%s642_s5 + $0x8] sm:$0xff]   ;;  %v459_v14 = vld [vmem:[%s642_s5 + $0x10] sm:$0xff]  }
  0x17   :  { %v351_v15 = vld [vmem:[%s639_s2] ss:$0 sm:$0xff]  ;;  %v460_v27 = vld [vmem:[%s642_s5 + $0x18] sm:$0xff]   ;;  %v462_v29 = vld [vmem:[%s642_s5 + $0x28] sm:$0xff]  }
  0x18   :  { %v461_v28 = vld [vmem:[%s642_s5 + $0x20] sm:$0xff]   ;;  %v463_v30 = vld [vmem:[%s642_s5 + $0x30] sm:$0xff]   ;;  %v464_v31 = vld [vmem:[%s642_s5 + $0x38] sm:$0xff]  }
  0x19   :  { %397 = vmatpush3.bf16.msra.mxu0 %v448_v2  ;;  %405 = vmatpush3.bf16.msra.mxu1 %v450_v5  ;;  %v355_v32 = vld [vmem:[%s641_s4] ss:$0 sm:$0xff] }
  0x1a   :  { %422 = vmatprep.subr.bf16.mxu0 %v496_v0  ;;  %406 = vmatprep.subr.bf16.mxu1 %v496_v0  ;;  %v364_v44 = vld [vmem:[%s643_s6] ss:$0 sm:$0xff] }
  0x1c   :  { %399 = vmatmul.mubr.msk.bf16.vlgmr.msra.gmra.mrb[0].mxu0 %vm65_vm1, %v41_v4 }
  0x1d   :  { %438 = vmatprep.mubr.msk.bf16.mxu0 %vm497_vm0, %v496_v0  ;;  %407 = vmatpush3.bf16.msra.mxu1 %v451_v6 }
  0x1e   :  { %408 = vmatprep.subr.bf16.mxu1 %v496_v0  ;;  %423 = vmatpush3.bf16.msra.mxu0 %v457_v12 }
  0x1f   :  { %424 = vmatprep.subr.bf16.mxu0 %v496_v0 }
  0x21   :  { %409 = vmatpush3.bf16.msra.mxu1 %v452_v7 }
  0x22   :  { %410 = vmatprep.subr.bf16.mxu1 %v496_v0  ;;  %425 = vmatpush3.bf16.msra.mxu0 %v458_v13 }
  0x23   :  { %426 = vmatprep.subr.bf16.mxu0 %v496_v0 }
  0x25   :  { %411 = vmatpush3.bf16.msra.mxu1 %v453_v8 }
  0x26   :  { %412 = vmatprep.subr.bf16.mxu1 %v496_v0  ;;  %427 = vmatpush3.bf16.msra.mxu0 %v459_v14 }
  0x27   :  { %428 = vmatprep.subr.bf16.mxu0 %v496_v0 }
  0x29   :  { %413 = vmatpush3.bf16.msra.mxu1 %v454_v9 }
  0x2a   :  { %414 = vmatprep.subr.bf16.mxu1 %v496_v0  ;;  %429 = vmatpush3.bf16.msra.mxu0 %v460_v27 }
  0x2b   :  { %430 = vmatprep.subr.bf16.mxu0 %v496_v0 }
  0x2d   :  { %415 = vmatpush3.bf16.msra.mxu1 %v455_v10 }
  0x2e   :  { %416 = vmatprep.subr.bf16.mxu1 %v496_v0  ;;  %431 = vmatpush3.bf16.msra.mxu0 %v461_v28 }
  0x2f   :  { %432 = vmatprep.subr.bf16.mxu0 %v496_v0 }
  0x31   :  { %417 = vmatpush3.bf16.msra.mxu1 %v456_v11 }
  0x32   :  { %433 = vmatpush3.bf16.msra.mxu0 %v462_v29 }
  0x33   :  { %434 = vmatprep.subr.bf16.mxu0 %v496_v0 }
  0x36   :  { %435 = vmatpush3.bf16.msra.mxu0 %v463_v30 }
  0x37   :  { %436 = vmatprep.subr.bf16.mxu0 %v496_v0 }
  0x3a   :  { %437 = vmatpush3.bf16.msra.mxu0 %v464_v31 }
  0xef   :  { %v103_v16 = vpop.f32.mrb[0].mxu0 }
  0xf0   :  { %v104_v17 = vadd.f32 %v351_v15, %v103_v16  ;;  %v400_v18 = vpop.f32.mrb[1].mxu0 }
  0xf1   :  { %v106_v19 = vpop.f32.mrb[2].mxu0 }
  0xf2   :  { %v111_v20 = vmul.f32 0.70710677, %v104_v17  ;;  %v401_v21 = vpop.f32.mrb[3].mxu0  ;;  %v109_v23 = vmul.f32 0.5, %v104_v17 }
  0xf4   :  { %465 = verf.f32 %v111_v20 }
  0xfe   :  { %v466_v22 = vpop.eup %465 }
  0xff   :  { %v113_v24 = vadd.f32 1.0, %v466_v22 }
 0x101   :  { %v114_v25 = vmul.f32 %v113_v24, %v109_v23 }
 0x103   :  { %v115_v26 = vpack.c.bf16 %v114_v25, %v114_v25 }
 0x105   :  { %419 = vmatmul.mubr.bf16.vlgmr.msra.gmra.mrb[0].mxu1 %v115_v26 }
 0x1d8   :  { %v221_v33 = vpop.f32.mrb[0].mxu1 }
 0x1d9   :  { %v222_v34 = vadd.f32 %v355_v32, %v221_v33  ;;  %v420_v35 = vpop.f32.mrb[1].mxu1 }
 0x1da   :  { %v224_v36 = vpop.f32.mrb[2].mxu1 }
 0x1db   :  { %v228_v37 = vmul.f32 0.70710677, %v222_v34  ;;  %v421_v38 = vpop.f32.mrb[3].mxu1  ;;  %v227_v40 = vmul.f32 0.5, %v222_v34 }
 0x1dd   :  { %467 = verf.f32 %v228_v37 }
 0x1e7   :  { %v468_v39 = vpop.eup %467 }
 0x1e8   :  { %v230_v41 = vadd.f32 1.0, %v468_v39 }
 0x1ea   :  { %v231_v42 = vmul.f32 %v230_v41, %v227_v40 }
 0x1ec   :  { %v232_v43 = vpack.c.bf16 %v231_v42, %v231_v42 }
 0x1ee   :  { %439 = vmatmul.mubr.bf16.vlgmr.msra.gmra.mrb[4].mxu0 %v232_v43 }
 0x2c1   :  { %v338_v45 = vpop.f32.mrb[4].mxu0 }
 0x2c2   :  { %v339_v46 = vadd.f32 %v364_v44, %v338_v45  ;;  %v440_v47 = vpop.f32.mrb[5].mxu0 }
 0x2c3   :  { %v341_v48 = vpop.f32.mrb[6].mxu0 }
 0x2c4   :  { %345 = vst.msk [vmem:[%s644_s7] sm:$0xff] %vm344_vm2, %v339_v46  ;;  %v441_v49 = vpop.f32.mrb[7].mxu0 }
 0x2c5   :  { %350 = vsyncpa [#allocation3], 1 }

</bundles_post_ra>
